<compile_context>
chip_gen: v5e
topology: v5e:2x2
jax: 0.10.0
libtpu: 0.0.40
codegen_flags: <defaults>
</compile_context>

<pallas_src>
import jax
import jax.numpy as jnp
from jax.experimental import pallas as pl
from jax.experimental.pallas import tpu as pltpu


def _round_up(x, m):
    return ((x + m - 1) // m) * m


def _cdiv(a, b):
    return (a + b - 1) // b


# ---------------------------------------------------------------------------
# Kernel: one batch tile of the Actor MLP (4 matmuls + ReLU/Tanh + affine).
# ---------------------------------------------------------------------------
def actor_mlp_kernel(x_ref,
                     w1_ref, b1_ref,
                     w2_ref, b2_ref,
                     w3_ref, b3_ref,
                     w4_ref, b4_ref,
                     bounds_ref, offset_ref,
                     out_ref):
    # Weights are pre-cast to bf16; activations cast to bf16 right before each
    # dot.  Accumulation / bias / ReLU / tanh / affine stay f32.
    h = jnp.dot(x_ref[...].astype(jnp.bfloat16), w1_ref[...],
                preferred_element_type=jnp.float32) + b1_ref[...]
    h = jnp.maximum(h, 0.0)

    h = jnp.dot(h.astype(jnp.bfloat16), w2_ref[...],
                preferred_element_type=jnp.float32) + b2_ref[...]
    h = jnp.maximum(h, 0.0)

    h = jnp.dot(h.astype(jnp.bfloat16), w3_ref[...],
                preferred_element_type=jnp.float32) + b3_ref[...]
    h = jnp.maximum(h, 0.0)

    # Final layer is zero-padded to 128 lanes -> lane-dense (unmasked) store.
    h = jnp.dot(h.astype(jnp.bfloat16), w4_ref[...],
                preferred_element_type=jnp.float32) + b4_ref[...]
    h = jnp.tanh(h)

    out_ref[...] = h * bounds_ref[...] + offset_ref[...]


# ---------------------------------------------------------------------------
# One-time parameter preparation (NOT in the per-forward hot path).
# ---------------------------------------------------------------------------
def prepare_params(params):
    """Cast weights to bf16 and zero-pad the last layer / bounds / offset to a
    lane-dense 128-wide output.  Padded columns produce tanh(0)*0+0 == 0 and
    are sliced away by the wrapper."""
    action_dim = params["w4"].shape[1]
    out_pad = _round_up(max(action_dim, 128), 128)
    pad_cols = out_pad - action_dim

    return {
        "w1": params["w1"].astype(jnp.bfloat16),            # (2*state_dim, 64)
        "b1": params["b1"].astype(jnp.float32),              # (1, 64)
        "w2": params["w2"].astype(jnp.bfloat16),             # (64, 64)
        "b2": params["b2"].astype(jnp.float32),
        "w3": params["w3"].astype(jnp.bfloat16),
        "b3": params["b3"].astype(jnp.float32),
        "w4": jnp.pad(params["w4"], ((0, 0), (0, pad_cols))).astype(jnp.bfloat16),
        "b4": jnp.pad(params["b4"], ((0, 0), (0, pad_cols))).astype(jnp.float32),
        "bounds": jnp.pad(params["action_bounds"],
                          ((0, 0), (0, pad_cols))).astype(jnp.float32),
        "offset": jnp.pad(params["offset"],
                          ((0, 0), (0, pad_cols))).astype(jnp.float32),
        "action_dim": action_dim,
        "out_pad": out_pad,
    }


def _choose_tile(batch, block_m):
    """Pick a batch tile that (a) keeps tiles <= block_m rows, (b) minimises
    padding waste, and (c) gives >= 2 grid steps when the batch is big enough
    to feed both v7x TensorCores."""
    n_steps = max(_cdiv(batch, block_m), 1)
    if batch >= 512:          # enough work to be worth splitting across 2 TCs
        n_steps = max(n_steps, 2)
    tm = _round_up(_cdiv(batch, n_steps), 8)
    padded_batch = _round_up(batch, tm)
    return tm, padded_batch


# ---------------------------------------------------------------------------
# Forward wrapper (hot path): concat, pad batch, single gridded pallas_call.
# ---------------------------------------------------------------------------
def actor_forward(state, goal, prepped, *, block_m=1024):
    batch = state.shape[0]
    action_dim = prepped["action_dim"]
    out_pad = prepped["out_pad"]

    # Single layer-1 input (merged dot): cat([state, goal], 1).
    x = jnp.concatenate([state, goal], axis=1)
    in_dim = x.shape[1]

    tm, padded_batch = _choose_tile(batch, block_m)
    x_p = jnp.pad(x, ((0, padded_batch - batch), (0, 0)))

    grid = (padded_batch // tm,)

    def resident(arr):
        # Whole-array block, constant index_map -> DMA'd once, VMEM-resident.
        zeros = (0,) * arr.ndim
        return pl.BlockSpec(arr.shape, lambda i, _z=zeros: _z)

    in_specs = [
        pl.BlockSpec((tm, in_dim), lambda i: (i, 0)),        # activation tile
        resident(prepped["w1"]), resident(prepped["b1"]),
        resident(prepped["w2"]), resident(prepped["b2"]),
        resident(prepped["w3"]), resident(prepped["b3"]),
        resident(prepped["w4"]), resident(prepped["b4"]),
        resident(prepped["bounds"]), resident(prepped["offset"]),
    ]
    out_specs = pl.BlockSpec((tm, out_pad), lambda i: (i, 0))

    out_padded = pl.pallas_call(
        actor_mlp_kernel,
        out_shape=jax.ShapeDtypeStruct((padded_batch, out_pad), jnp.float32),
        grid=grid,
        in_specs=in_specs,
        out_specs=out_specs,
        compiler_params=pltpu.CompilerParams(
            dimension_semantics=("parallel",),   # megacore sharding on v7x
        ),
    )(x_p,
      prepped["w1"], prepped["b1"],
      prepped["w2"], prepped["b2"],
      prepped["w3"], prepped["b3"],
      prepped["w4"], prepped["b4"],
      prepped["bounds"], prepped["offset"])

    return out_padded[:batch, :action_dim]


# ---------------------------------------------------------------------------
# Synthetic params + pure-JAX reference (for the self-test).
# ---------------------------------------------------------------------------
def init_params(key, state_dim, action_dim, hidden=64):
    """Deterministic synthetic parameter init (PyTorch-Linear-like uniform)."""
    def linear(key, fan_in, fan_out):
        kw, kb = jax.random.split(key)
        bound = 1.0 / jnp.sqrt(fan_in)
        w = jax.random.uniform(kw, (fan_in, fan_out), jnp.float32, -bound, bound)
        b = jax.random.uniform(kb, (1, fan_out), jnp.float32, -bound, bound)
        return w, b

    k1, k2, k3, k4, kbnd, koff = jax.random.split(key, 6)
    w1, b1 = linear(k1, 2 * state_dim, hidden)
    w2, b2 = linear(k2, hidden, hidden)
    w3, b3 = linear(k3, hidden, hidden)
    w4, b4 = linear(k4, hidden, action_dim)

    # action_bounds / offset are constructor constants in the torch module;
    # build deterministic synthetic values of shape (1, action_dim).
    action_bounds = 1.0 + jax.random.uniform(kbnd, (1, action_dim), jnp.float32)
    offset = 0.1 * jax.random.normal(koff, (1, action_dim), jnp.float32)

    return {
        "w1": w1, "b1": b1,
        "w2": w2, "b2": b2,
        "w3": w3, "b3": b3,
        "w4": w4, "b4": b4,
        "action_bounds": action_bounds,
        "offset": offset,
    }


def actor_reference(state, goal, params):
    """Pure-JAX f32 reference for correctness checking."""
    x = jnp.concatenate([state, goal], axis=1)
    h = jnp.maximum(x @ params["w1"] + params["b1"], 0.0)
    h = jnp.maximum(h @ params["w2"] + params["b2"], 0.0)
    h = jnp.maximum(h @ params["w3"] + params["b3"], 0.0)
    h = jnp.tanh(h @ params["w4"] + params["b4"])
    return h * params["action_bounds"] + params["offset"]


if __name__ == "__main__":
    key = jax.random.PRNGKey(0)
    k_param, k_state, k_goal, k_state2, k_goal2 = jax.random.split(key, 5)

    batch = 2
    state_dim = 8
    action_dim = 4

    params = init_params(k_param, state_dim, action_dim)
    prepped = prepare_params(params)   # one-time prep, out of the hot path

    # Tolerance is loosened vs. a pure-f32 kernel because matmul operands are
    # bf16 (accumulation / activations / affine stay f32).
    ATOL = 5e-2
    RTOL = 5e-2

    # Small-batch check (single grid step, batch padded to 8 sublanes).
    state = jax.random.normal(k_state, (batch, state_dim), jnp.float32)
    goal = jax.random.normal(k_goal, (batch, state_dim), jnp.float32)
    out = jax.block_until_ready(actor_forward(state, goal, prepped))
    ref = actor_reference(state, goal, params)
    assert out.shape == (batch, action_dim)
    assert jnp.allclose(out, ref, atol=ATOL, rtol=RTOL), \
        "mismatch vs reference (small)"

    # Multi-tile check: exercises the batch grid + padding path.
    batch2 = 20
    state2 = jax.random.normal(k_state2, (batch2, state_dim), jnp.float32)
    goal2 = jax.random.normal(k_goal2, (batch2, state_dim), jnp.float32)
    out2 = jax.block_until_ready(
        actor_forward(state2, goal2, prepped, block_m=8))
    ref2 = actor_reference(state2, goal2, params)
    assert out2.shape == (batch2, action_dim)
    assert jnp.allclose(out2, ref2, atol=ATOL, rtol=RTOL), \
        "mismatch vs reference (gridded)"

    print("KERNEL_OK")
</pallas_src>

<mosaic_0001>
module attributes {stable_mosaic.version = 11 : i64} {
  func.func @actor_mlp_kernel(%arg0: i32, %arg1: memref<8x16xf32, #tpu.memory_space<vmem>>, %arg2: memref<16x64xbf16, #tpu.memory_space<vmem>>, %arg3: memref<1x64xf32, #tpu.memory_space<vmem>>, %arg4: memref<64x64xbf16, #tpu.memory_space<vmem>>, %arg5: memref<1x64xf32, #tpu.memory_space<vmem>>, %arg6: memref<64x64xbf16, #tpu.memory_space<vmem>>, %arg7: memref<1x64xf32, #tpu.memory_space<vmem>>, %arg8: memref<64x128xbf16, #tpu.memory_space<vmem>>, %arg9: memref<1x128xf32, #tpu.memory_space<vmem>>, %arg10: memref<1x128xf32, #tpu.memory_space<vmem>>, %arg11: memref<1x128xf32, #tpu.memory_space<vmem>>, %arg12: memref<8x128xf32, #tpu.memory_space<vmem>>) attributes {dimension_semantics = [#tpu.dimension_semantics<parallel>], iteration_bounds = array<i64: 1>, scalar_prefetch = 0 : i64, scratch_operands = 0 : i64, tpu.core_type = #tpu.core_type<tc>, window_params = [{transform_indices = @transform_0, window_bounds = array<i64: 8, 16>}, {pipeline_mode = #tpu.pipeline_mode<synchronous>, transform_indices = @transform_1, window_bounds = array<i64: 16, 64>}, {pipeline_mode = #tpu.pipeline_mode<synchronous>, transform_indices = @transform_2, window_bounds = array<i64: 1, 64>}, {pipeline_mode = #tpu.pipeline_mode<synchronous>, transform_indices = @transform_3, window_bounds = array<i64: 64, 64>}, {pipeline_mode = #tpu.pipeline_mode<synchronous>, transform_indices = @transform_4, window_bounds = array<i64: 1, 64>}, {pipeline_mode = #tpu.pipeline_mode<synchronous>, transform_indices = @transform_5, window_bounds = array<i64: 64, 64>}, {pipeline_mode = #tpu.pipeline_mode<synchronous>, transform_indices = @transform_6, window_bounds = array<i64: 1, 64>}, {pipeline_mode = #tpu.pipeline_mode<synchronous>, transform_indices = @transform_7, window_bounds = array<i64: 64, 128>}, {pipeline_mode = #tpu.pipeline_mode<synchronous>, transform_indices = @transform_8, window_bounds = array<i64: 1, 128>}, {pipeline_mode = #tpu.pipeline_mode<synchronous>, transform_indices = @transform_9, window_bounds = array<i64: 1, 128>}, {pipeline_mode = #tpu.pipeline_mode<synchronous>, transform_indices = @transform_10, window_bounds = array<i64: 1, 128>}, {transform_indices = @transform_11, window_bounds = array<i64: 8, 128>}]} {
    %c0 = arith.constant 0 : index
    %c0_0 = arith.constant 0 : index
    %0 = vector.load %arg1[%c0, %c0_0] : memref<8x16xf32, #tpu.memory_space<vmem>>, vector<8x16xf32>
    %1 = arith.truncf %0 : vector<8x16xf32> to vector<8x16xbf16>
    %c0_1 = arith.constant 0 : index
    %c0_2 = arith.constant 0 : index
    %2 = vector.load %arg2[%c0_1, %c0_2] : memref<16x64xbf16, #tpu.memory_space<vmem>>, vector<16x64xbf16>
    %cst = arith.constant dense<0.000000e+00> : vector<8x64xf32>
    %3 = tpu.matmul %1, %2, %cst {dimension_numbers = #tpu.dot_dimension_numbers<[1], [0], [0], [1], [0, 0, 1, 1], [], []>} : vector<8x16xbf16>, vector<16x64xbf16>, vector<8x64xf32> -> vector<8x64xf32>
    %c0_3 = arith.constant 0 : index
    %c0_4 = arith.constant 0 : index
    %4 = vector.load %arg3[%c0_3, %c0_4] : memref<1x64xf32, #tpu.memory_space<vmem>>, vector<1x64xf32>
    %5 = vector.broadcast %4 : vector<1x64xf32> to vector<8x64xf32>
    %6 = arith.addf %3, %5 : vector<8x64xf32>
    %cst_5 = arith.constant 0.000000e+00 : f32
    %7 = vector.broadcast %cst_5 : f32 to vector<8x64xf32>
    %8 = arith.maximumf %6, %7 : vector<8x64xf32>
    %9 = arith.truncf %8 : vector<8x64xf32> to vector<8x64xbf16>
    %c0_6 = arith.constant 0 : index
    %c0_7 = arith.constant 0 : index
    %10 = vector.load %arg4[%c0_6, %c0_7] : memref<64x64xbf16, #tpu.memory_space<vmem>>, vector<64x64xbf16>
    %cst_8 = arith.constant dense<0.000000e+00> : vector<8x64xf32>
    %11 = tpu.matmul %9, %10, %cst_8 {dimension_numbers = #tpu.dot_dimension_numbers<[1], [0], [0], [1], [0, 0, 1, 1], [], []>} : vector<8x64xbf16>, vector<64x64xbf16>, vector<8x64xf32> -> vector<8x64xf32>
    %c0_9 = arith.constant 0 : index
    %c0_10 = arith.constant 0 : index
    %12 = vector.load %arg5[%c0_9, %c0_10] : memref<1x64xf32, #tpu.memory_space<vmem>>, vector<1x64xf32>
    %13 = vector.broadcast %12 : vector<1x64xf32> to vector<8x64xf32>
    %14 = arith.addf %11, %13 : vector<8x64xf32>
    %cst_11 = arith.constant 0.000000e+00 : f32
    %15 = vector.broadcast %cst_11 : f32 to vector<8x64xf32>
    %16 = arith.maximumf %14, %15 : vector<8x64xf32>
    %17 = arith.truncf %16 : vector<8x64xf32> to vector<8x64xbf16>
    %c0_12 = arith.constant 0 : index
    %c0_13 = arith.constant 0 : index
    %18 = vector.load %arg6[%c0_12, %c0_13] : memref<64x64xbf16, #tpu.memory_space<vmem>>, vector<64x64xbf16>
    %cst_14 = arith.constant dense<0.000000e+00> : vector<8x64xf32>
    %19 = tpu.matmul %17, %18, %cst_14 {dimension_numbers = #tpu.dot_dimension_numbers<[1], [0], [0], [1], [0, 0, 1, 1], [], []>} : vector<8x64xbf16>, vector<64x64xbf16>, vector<8x64xf32> -> vector<8x64xf32>
    %c0_15 = arith.constant 0 : index
    %c0_16 = arith.constant 0 : index
    %20 = vector.load %arg7[%c0_15, %c0_16] : memref<1x64xf32, #tpu.memory_space<vmem>>, vector<1x64xf32>
    %21 = vector.broadcast %20 : vector<1x64xf32> to vector<8x64xf32>
    %22 = arith.addf %19, %21 : vector<8x64xf32>
    %cst_17 = arith.constant 0.000000e+00 : f32
    %23 = vector.broadcast %cst_17 : f32 to vector<8x64xf32>
    %24 = arith.maximumf %22, %23 : vector<8x64xf32>
    %25 = arith.truncf %24 : vector<8x64xf32> to vector<8x64xbf16>
    %c0_18 = arith.constant 0 : index
    %c0_19 = arith.constant 0 : index
    %26 = vector.load %arg8[%c0_18, %c0_19] : memref<64x128xbf16, #tpu.memory_space<vmem>>, vector<64x128xbf16>
    %cst_20 = arith.constant dense<0.000000e+00> : vector<8x128xf32>
    %27 = tpu.matmul %25, %26, %cst_20 {dimension_numbers = #tpu.dot_dimension_numbers<[1], [0], [0], [1], [0, 0, 1, 1], [], []>} : vector<8x64xbf16>, vector<64x128xbf16>, vector<8x128xf32> -> vector<8x128xf32>
    %c0_21 = arith.constant 0 : index
    %c0_22 = arith.constant 0 : index
    %28 = vector.load %arg9[%c0_21, %c0_22] : memref<1x128xf32, #tpu.memory_space<vmem>>, vector<1x128xf32>
    %29 = vector.broadcast %28 : vector<1x128xf32> to vector<8x128xf32>
    %30 = arith.addf %27, %29 : vector<8x128xf32>
    %31 = math.tanh %30 : vector<8x128xf32>
    %c0_23 = arith.constant 0 : index
    %c0_24 = arith.constant 0 : index
    %32 = vector.load %arg10[%c0_23, %c0_24] : memref<1x128xf32, #tpu.memory_space<vmem>>, vector<1x128xf32>
    %33 = vector.broadcast %32 : vector<1x128xf32> to vector<8x128xf32>
    %34 = arith.mulf %31, %33 : vector<8x128xf32>
    %c0_25 = arith.constant 0 : index
    %c0_26 = arith.constant 0 : index
    %35 = vector.load %arg11[%c0_25, %c0_26] : memref<1x128xf32, #tpu.memory_space<vmem>>, vector<1x128xf32>
    %36 = vector.broadcast %35 : vector<1x128xf32> to vector<8x128xf32>
    %37 = arith.addf %34, %36 : vector<8x128xf32>
    %c0_27 = arith.constant 0 : index
    %c0_28 = arith.constant 0 : index
    %38 = vector.load %arg12[%c0_27, %c0_28] : memref<8x128xf32, #tpu.memory_space<vmem>>, vector<8x128xf32>
    tpu.vector_store %arg12[%c0_27, %c0_28], %37 {strides = array<i32>} : memref<8x128xf32, #tpu.memory_space<vmem>>, vector<8x128xf32>,
    return
  }
  func.func @transform_0(%arg0: i32) -> (i32, i32) {
    %c0_i32 = arith.constant 0 : i32
    %c0_i32_0 = arith.constant 0 : i32
    return %arg0, %c0_i32 : i32, i32
  }
  func.func @transform_1(%arg0: i32) -> (i32, i32) {
    %c0_i32 = arith.constant 0 : i32
    %c0_i32_0 = arith.constant 0 : i32
    %c0_i32_1 = arith.constant 0 : i32
    return %c0_i32, %c0_i32_0 : i32, i32
  }
  func.func @transform_2(%arg0: i32) -> (i32, i32) {
    %c0_i32 = arith.constant 0 : i32
    %c0_i32_0 = arith.constant 0 : i32
    %c0_i32_1 = arith.constant 0 : i32
    return %c0_i32, %c0_i32_0 : i32, i32
  }
  func.func @transform_3(%arg0: i32) -> (i32, i32) {
    %c0_i32 = arith.constant 0 : i32
    %c0_i32_0 = arith.constant 0 : i32
    %c0_i32_1 = arith.constant 0 : i32
    return %c0_i32, %c0_i32_0 : i32, i32
  }
  func.func @transform_4(%arg0: i32) -> (i32, i32) {
    %c0_i32 = arith.constant 0 : i32
    %c0_i32_0 = arith.constant 0 : i32
    %c0_i32_1 = arith.constant 0 : i32
    return %c0_i32, %c0_i32_0 : i32, i32
  }
  func.func @transform_5(%arg0: i32) -> (i32, i32) {
    %c0_i32 = arith.constant 0 : i32
    %c0_i32_0 = arith.constant 0 : i32
    %c0_i32_1 = arith.constant 0 : i32
    return %c0_i32, %c0_i32_0 : i32, i32
  }
  func.func @transform_6(%arg0: i32) -> (i32, i32) {
    %c0_i32 = arith.constant 0 : i32
    %c0_i32_0 = arith.constant 0 : i32
    %c0_i32_1 = arith.constant 0 : i32
    return %c0_i32, %c0_i32_0 : i32, i32
  }
  func.func @transform_7(%arg0: i32) -> (i32, i32) {
    %c0_i32 = arith.constant 0 : i32
    %c0_i32_0 = arith.constant 0 : i32
    %c0_i32_1 = arith.constant 0 : i32
    return %c0_i32, %c0_i32_0 : i32, i32
  }
  func.func @transform_8(%arg0: i32) -> (i32, i32) {
    %c0_i32 = arith.constant 0 : i32
    %c0_i32_0 = arith.constant 0 : i32
    %c0_i32_1 = arith.constant 0 : i32
    return %c0_i32, %c0_i32_0 : i32, i32
  }
  func.func @transform_9(%arg0: i32) -> (i32, i32) {
    %c0_i32 = arith.constant 0 : i32
    %c0_i32_0 = arith.constant 0 : i32
    %c0_i32_1 = arith.constant 0 : i32
    return %c0_i32, %c0_i32_0 : i32, i32
  }
  func.func @transform_10(%arg0: i32) -> (i32, i32) {
    %c0_i32 = arith.constant 0 : i32
    %c0_i32_0 = arith.constant 0 : i32
    %c0_i32_1 = arith.constant 0 : i32
    return %c0_i32, %c0_i32_0 : i32, i32
  }
  func.func @transform_11(%arg0: i32) -> (i32, i32) {
    %c0_i32 = arith.constant 0 : i32
    %c0_i32_0 = arith.constant 0 : i32
    return %arg0, %c0_i32 : i32, i32
  }
}

</mosaic_0001>

<bundles_post_ra>
// kernel: tpu_custom_call.1
= control target key start
LH: loop header
LB: loop body
LE: loop exit
PB: predicated region body
PF: predicated region fallthrough
CT: control target
= control target key end

     0   :  { %16 = vsyncpa [#allocation3], 0  ;;  %s685_s0 = inlined_call_operand.hbm [shape: f32[8,16], index: 0, kind: input, shape index: {}]   ;;  %s686_s1 = inlined_call_operand.hbm [shape: bf16[16,64], index: 1, kind: input, shape index: {}]   ;;  %s687_s2 = inlined_call_operand.vmem [shape: f32[1,64], index: 2, kind: input, shape index: {}]   ;;  %s688_s3 = inlined_call_operand.hbm [shape: bf16[64,64], index: 3, kind: input, shape index: {}]   ;;  %s689_s4 = inlined_call_operand.vmem [shape: f32[1,64], index: 4, kind: input, shape index: {}]   ;;  %s690_s5 = inlined_call_operand.hbm [shape: bf16[64,64], index: 5, kind: input, shape index: {}]   ;;  %s691_s6 = inlined_call_operand.vmem [shape: f32[1,64], index: 6, kind: input, shape index: {}]   ;;  %s692_s7 = inlined_call_operand.hbm [shape: bf16[64,128], index: 7, kind: input, shape index: {}]   ;;  %s693_s8 = inlined_call_operand.vmem [shape: f32[1,128], index: 8, kind: input, shape index: {}]   ;;  %s694_s9 = inlined_call_operand.vmem [shape: f32[1,128], index: 9, kind: input, shape index: {}]   ;;  %s695_s10 = inlined_call_operand.vmem [shape: f32[1,128], index: 10, kind: input, shape index: {}]   ;;  %s696_s11 = inlined_call_operand.hbm [shape: f32[8,128], index: 11, kind: output, shape index: {}]  }
   0x1   :  { %17 = vsyncpa [#allocation6], 0 }
   0x2   :  { %18 = vsyncpa [#allocation9], 0  ;;  %s35_s19 = sshll.u32 %s686_s1, 4  ;;  %s36_s19 = int_to_ptr.hbm [resolvable:$true] %s35_s19 }
   0x3   :  { %19 = vsyncpa [#allocation4], 0  ;;  %s578_s20 = smov [#allocation5]   ;;  %s65_s24 = sshll.u32 %s690_s5, 4  ;;  %s66_s24 = int_to_ptr.hbm [resolvable:$true] %s65_s24 }
   0x4   :  { %s37_s21 = sshll.u32 %s578_s20, 4  ;;  %s579_s25 = smov 64   ;;  %s38_s21 = int_to_ptr.vmem [resolvable:$true] %s37_s21 }
   0x5   :  { %s580_s26 = smov 4   ;;  %s581_s27 = smov [#allocation8]  }
   0x6   :  { %43 = dma.hbm_to_vmem [thread:$0]  %s36_s19, 128, %s38_s21, [#allocation6], %s579_s25, %s579_s25, %s580_s26  }
   0x7   :  { %s67_s28 = sshll.u32 %s581_s27, 4  ;;  %s25_s12 = sshll.u32 %s685_s0, 4  ;;  %s68_s28 = int_to_ptr.vmem [resolvable:$true] %s67_s28  ;;  %s26_s12 = int_to_ptr.hbm [resolvable:$true] %s25_s12 }
   0x8   :  { %73 = dma.hbm_to_vmem [thread:$0]  %s66_s24, 512, %s68_s28, [#allocation9], %s579_s25, %s579_s25, %s580_s26  }
   0x9   :  { %s50_s14 = sshll.u32 %s688_s3, 4  ;;  %s582_s15 = smov [#allocation2]   ;;  %s51_s14 = int_to_ptr.hbm [resolvable:$true] %s50_s14 }
   0xa   :  { %s27_s16 = sshll.u32 %s582_s15, 4  ;;  %s583_s5 = smov [#allocation7]   ;;  %s28_s16 = int_to_ptr.vmem [resolvable:$true] %s27_s16 }
   0xb   :  { %30 = dma.hbm_to_vmem [thread:$0]  %s26_s12, 128, %s28_s16, [#allocation3]  }
   0xc   :  { %s52_s17 = sshll.u32 %s583_s5, 4  ;;  %s80_s20 = sshll.u32 %s692_s7, 4  ;;  %s53_s17 = int_to_ptr.vmem [resolvable:$true] %s52_s17  ;;  %s81_s20 = int_to_ptr.hbm [resolvable:$true] %s80_s20 }
   0xd   :  { %58 = dma.hbm_to_vmem [thread:$0]  %s51_s14, 512, %s53_s17, [#allocation6], %s579_s25, %s579_s25, %s580_s26  }
   0xe   :  { %s584_s0 = smov [#allocation10]  }
   0xf   :  { %s82_s21 = sshll.u32 %s584_s0, 4  ;;  %s83_s21 = int_to_ptr.vmem [resolvable:$true] %s82_s21 }
  0x10   :  { %88 = dma.hbm_to_vmem [thread:$0]  %s81_s20, 512, %s83_s21, [#allocation9], %s579_s25, %s579_s25, %s580_s26  }
  0x11   :  { %570 = dma.done.wait [#allocation3], 128  }
  0x12   :  { %571 = vsyncadd [#allocation3], 4294967168 }
  0x13   :  { %572 = dma.done.wait [#allocation6], 640  }
  0x14   :  { %573 = vsyncadd [#allocation6], 4294966656 }
  0x15   :  { %574 = dma.done.wait [#allocation9], 1024  }
  0x16   :  { %575 = vsyncadd [#allocation9], 4294966272  ;;  %v397_v0 = vld [vmem:[#allocation5] sm:$0xff]  ;;  %v116_v1 = vld [vmem:[#allocation2] sm:$0xff]  ;;  %vm130_vm0 = vcmask 130048   ;;  %vm185_vm1 = vcmask 523264  }
  0x17   :  { %v401_v2 = vld [vmem:[#allocation7 + $0x18] sm:$0xff]  ;;  %v117_v3 = vpack.c.bf16 %v116_v1, %v116_v1  ;;  %v400_v4 = vld [vmem:[#allocation7 + $0x10] sm:$0xff]  ;;  %141 = vmatpush.bf16.msra.mxu0 %v397_v0  ;;  %v399_v5 = vld [vmem:[#allocation7 + $0x8] sm:$0xff]  ;;  %s585_s29 = smov [#allocation11]   ;;  %s329_s13 = sshll.u32 %s696_s11, 4  ;;  %s330_s13 = int_to_ptr.hbm [resolvable:$true] %s329_s13 }
  0x18   :  { %193 = vmatpush.bf16.msra.mxu1 %v401_v2  ;;  %v398_v6 = vld [vmem:[#allocation7] sm:$0xff]  ;;  %v405_v7 = vld [vmem:[#allocation8 + $0x18] sm:$0xff]  ;;  %v404_v8 = vld [vmem:[#allocation8 + $0x10] sm:$0xff]  ;;  %s327_s30 = sshll.u32 %s585_s29, 4  ;;  %s328_s30 = int_to_ptr.vmem [resolvable:$true] %s327_s30 }
  0x19   :  { %247 = vmatpush.bf16.msra.mxu2 %v405_v7  ;;  %v418_v9 = vld [vmem:[%s687_s2] ss:$0 sm:$0xff]  ;;  %v403_v15 = vld [vmem:[#allocation8 + $0x8] sm:$0xff]  ;;  %v402_v16 = vld [vmem:[#allocation8] sm:$0xff] }
  0x1a   :  { %345 = vmatmul.msk.bf16.vlgmr.msra.gmra.mxu0 %vm130_vm0, %v117_v3  ;;  %v409_v17 = vld [vmem:[#allocation10 + $0x18] sm:$0xff]  ;;  %v408_v18 = vld [vmem:[#allocation10 + $0x10] sm:$0xff]  ;;  %v407_v25 = vld [vmem:[#allocation10 + $0x8] sm:$0xff] }
  0x1b   :  { %301 = vmatpush.bf16.msra.mxu3 %v409_v17  ;;  %v419_v19 = vld [vmem:[%s689_s4] ss:$0 sm:$0xff]  ;;  %v406_v26 = vld [vmem:[#allocation10] sm:$0xff] }
  0x1c   :  { %194 = vmatpush.bf16.msra.mxu1 %v400_v4  ;;  %v420_v27 = vld [vmem:[%s691_s6] ss:$0 sm:$0xff] }
  0x1d   :  { %248 = vmatpush.bf16.msra.mxu2 %v404_v8  ;;  %v421_v33 = vld [vmem:[%s693_s8] ss:$0 sm:$0xff] }
  0x1e   :  { %v422_v36 = vld [vmem:[%s694_s9] ss:$0 sm:$0xff] }
  0x1f   :  { %302 = vmatpush.bf16.msra.mxu3 %v408_v18  ;;  %v423_v38 = vld [vmem:[%s695_s10] ss:$0 sm:$0xff] }
  0x20   :  { %195 = vmatpush.bf16.msra.mxu1 %v399_v5 }
  0x21   :  { %249 = vmatpush.bf16.msra.mxu2 %v403_v15 }
  0x23   :  { %303 = vmatpush.bf16.msra.mxu3 %v407_v25 }
  0x24   :  { %196 = vmatpush.bf16.msra.mxu1 %v398_v6 }
  0x25   :  { %250 = vmatpush.bf16.msra.mxu2 %v402_v16 }
  0x27   :  { %304 = vmatpush.bf16.msra.mxu3 %v406_v26 }
  0x97   :  { %v143_v10 = vpop.f32.mrf.mxu0 }
  0x98   :  { %v144_v11 = vadd.f32 %v418_v9, %v143_v10 }
  0x9a   :  { %v147_v12 = vmax.f32 %v144_v11, 0.0 }
  0x9c   :  { %v148_v13 = vpack.c.bf16 %v147_v12, %v147_v12 }
  0x9e   :  { %362 = vmatmul.msk.bf16.vlgmr.msra.gmra.mxu1 %vm185_vm1, %v148_v13 }
  0x9f   :  { %v145_v14 = vpop.f32.mrf.mxu0 }
 0x11b   :  { %v198_v20 = vpop.f32.mrf.mxu1 }
 0x11c   :  { %v199_v21 = vadd.f32 %v419_v19, %v198_v20 }
 0x11e   :  { %v202_v22 = vmax.f32 %v199_v21, 0.0 }
 0x120   :  { %v203_v23 = vpack.c.bf16 %v202_v22, %v202_v22 }
 0x122   :  { %379 = vmatmul.msk.bf16.vlgmr.msra.gmra.mxu2 %vm185_vm1, %v203_v23 }
 0x123   :  { %v200_v24 = vpop.f32.mrf.mxu1 }
 0x1a5   :  { %v252_v28 = vpop.f32.mrf.mxu2 }
 0x1a6   :  { %v253_v29 = vadd.f32 %v420_v27, %v252_v28 }
 0x1a8   :  { %v256_v30 = vmax.f32 %v253_v29, 0.0 }
 0x1aa   :  { %v257_v31 = vpack.c.bf16 %v256_v30, %v256_v30 }
 0x1ac   :  { %396 = vmatmul.msk.bf16.vlgmr.msra.gmra.mxu3 %vm185_vm1, %v257_v31 }
 0x1ad   :  { %v254_v32 = vpop.f32.mrf.mxu2 }
 0x22f   :  { %v306_v34 = vpop.f32.mrf.mxu3 }
 0x230   :  { %v307_v35 = vadd.f32 %v421_v33, %v306_v34 }
 0x232   :  { %424 = vtanh.f32 %v307_v35 }
 0x237   :  { %v308_v37 = vpop.f32.mrf.mxu3 }
 0x238   :  { %v425_v39 = vpop.eup %424 }
 0x239   :  { %v315_v40 = vmul.f32 %v425_v39, %v422_v36 }
 0x23b   :  { %v320_v41 = vadd.f32 %v423_v38, %v315_v40 }
 0x23d   :  { %321 = vst [vmem:[#allocation11] sm:$0xff] %v320_v41 }
 0x23e   :  { %332 = dma.vmem_to_hbm [thread:$0]  %s328_s30, 128, %s330_s13, [#allocation4]  }
 0x23f   :  { %576 = dma.done.wait [#allocation4], 128  }
 0x240   :  { %577 = vsyncadd [#allocation4], 4294967168 }
 0x241   :  { %337 = vsyncpa [#allocation3], 1 }
 0x242   :  { %338 = vsyncpa [#allocation6], 1 }
 0x243   :  { %339 = vsyncpa [#allocation9], 1 }
 0x244   :  { %340 = vsyncpa [#allocation4], 1 }

</bundles_post_ra>
